<compile_context>
chip_gen: v6e
topology: v6e:2x2x1
jax: 0.10.0
libtpu: 0.0.40
codegen_flags: <defaults>
</compile_context>

<pallas_src>
import math

import jax
import jax.numpy as jnp
from jax.experimental import pallas as pl
from jax.experimental.pallas import tpu as pltpu


def _round_up(v: int, m: int) -> int:
    return (v + m - 1) // m * m


def _fused_kernel(x_ref, w_ref, b_ref, o_ref):
    # x_ref: [tm, K], w_ref: [K, tn], b_ref: [1, tn], o_ref: [tm, tn]
    acc = jnp.dot(x_ref[...], w_ref[...], preferred_element_type=jnp.float32)
    o_ref[...] = jnp.maximum(acc + b_ref[...], 0.0).astype(o_ref.dtype)


def _ktiled_kernel(x_ref, w_ref, b_ref, o_ref, acc_ref):
    # Same as _fused_kernel, but the reduction (K) axis is tiled on grid axis 2.
    k = pl.program_id(2)

    @pl.when(k == 0)
    def _():
        acc_ref[...] = jnp.zeros_like(acc_ref)

    acc_ref[...] += jnp.dot(x_ref[...], w_ref[...],
                            preferred_element_type=jnp.float32)

    @pl.when(k == pl.num_programs(2) - 1)
    def _():
        o_ref[...] = jnp.maximum(acc_ref[...] + b_ref[...], 0.0).astype(o_ref.dtype)


def _vmem_capacity_bytes() -> int:
    """Per-TensorCore VMEM; conservative 64 MiB (v7x) fallback if unqueryable."""
    try:
        info = pltpu.get_tpu_info()
        cap = int(getattr(info, "vmem_capacity_bytes", 0))
        if cap > 0:
            return cap
    except Exception:
        pass
    return 64 * 2**20


def value_head_core(x: jax.Array, w: jax.Array, b: jax.Array, *,
                    compute_dtype=None) -> jax.Array:
    """relu(x @ w + b) with matmul, bias add and ReLU fused in one Pallas kernel.

    x: [B, K], w: [K, N], b: [N] -> [B, N] (dtype of x).
    compute_dtype: optional narrower dtype (e.g. jnp.bfloat16) for the streamed
    x/w operands on v6e/v7x; accumulation stays float32.
    """
    out_dtype = x.dtype
    if compute_dtype is not None:
        x = x.astype(compute_dtype)
        w = w.astype(compute_dtype)

    B, K = x.shape
    K2, N = w.shape
    assert K == K2 and b.shape == (N,)
    itemsize = jnp.dtype(x.dtype).itemsize
    b = b.astype(jnp.float32)

    # ---- Generation-aware budgets --------------------------------------------
    vmem_cap = _vmem_capacity_bytes()
    small_vmem = vmem_cap <= 64 * 2**20              # v7x
    scoped_cap = (48 if small_vmem else 96) * 2**20  # leave >=25% physical headroom
    work_budget = scoped_cap // 2                    # double-buffered working set target
    slab_budget = scoped_cap // 3                    # max double-buffered weight slab
    tm_pref = 256 if small_vmem else 512             # bigger tiles on 128 MiB chips

    # ---- N tiling: keep a single, unpadded N block whenever possible ---------
    if N <= 512 or 2 * K * N * itemsize <= slab_budget:
        tn = n_pad = N                               # exact output, no slice needed
    else:
        n_pad = _round_up(N, 128)                    # lane-dense tiles
        tn = max(128, (slab_budget // (2 * K * itemsize)) // 128 * 128)
        if tn >= 256:
            tn -= tn % 256                           # v6e/v7x MXU is 256 columns wide
        tn = min(tn, n_pad)
    grid_n = pl.cdiv(n_pad, tn)
    if n_pad != N:
        w = jnp.pad(w, ((0, 0), (0, n_pad - N)))
        b = jnp.pad(b, (0, n_pad - N))
    b2 = b.reshape(1, n_pad)

    # ---- Row tiling: >=2 row blocks for B >= 16 so both v7x cores get work ---
    if B < 16:
        tm = B                                       # single full-dim block
    elif B <= 2 * tm_pref:
        tm = _round_up(pl.cdiv(B, 2), 8)             # exactly two row blocks
    else:
        tm = tm_pref

    def footprint(tm_, tk_, ktiled):
        f = 2 * itemsize * (tm_ * tk_ + tk_ * tn)    # double-buffered x + w blocks
        f += 2 * 4 * (tn + tm_ * tn)                 # bias + output blocks (f32)
        if ktiled:
            f += 4 * tm_ * tn                        # f32 accumulator scratch
        return f

    # Shrink tm first (keeps K resident, weight read once).
    while tm > 64 and footprint(tm, K, False) > work_budget:
        tm = _round_up(tm // 2, 8)

    # K-tiling fallback for very large K (mainly matters on v7x's 64 MiB VMEM).
    tk, grid_k = K, 1
    if footprint(tm, K, False) > work_budget:
        tk = min(K, 2048)
        while tk > 512 and footprint(tm, tk, True) > work_budget:
            tk //= 2
        grid_k = pl.cdiv(K, tk)
        if grid_k == 1:
            tk = K
        elif K % tk:
            # Zero-pad K so the ragged reduction block never reads garbage.
            kp = grid_k * tk
            x = jnp.pad(x, ((0, 0), (0, kp - K)))
            w = jnp.pad(w, ((0, kp - K), (0, 0)))
            K = kp
    grid_m = pl.cdiv(B, tm)
    ktiled = grid_k > 1

    # ---- Grid-axis order: minimize redundant HBM refetch when N is tiled -----
    n_outer = (grid_n > 1 and not ktiled
               and (grid_n - 1) * B < (grid_m - 1) * n_pad)
    if n_outer:
        grid = (grid_n, grid_m, grid_k)
        x_map = lambda j, i, k: (i, k)
        w_map = lambda j, i, k: (k, j)
        b_map = lambda j, i, k: (0, j)
        o_map = lambda j, i, k: (i, j)
    else:
        grid = (grid_m, grid_n, grid_k)
        x_map = lambda i, j, k: (i, k)
        w_map = lambda i, j, k: (k, j)
        b_map = lambda i, j, k: (0, j)
        o_map = lambda i, j, k: (i, j)

    kernel = _ktiled_kernel if ktiled else _fused_kernel
    scratch = [pltpu.VMEM((tm, tn), jnp.float32)] if ktiled else []

    compiler_kwargs = dict(dimension_semantics=("parallel", "parallel", "arbitrary"))
    vmem_need = footprint(tm, tk, ktiled)
    if vmem_need > 12 * 2**20:                       # only raise above the default
        compiler_kwargs["vmem_limit_bytes"] = int(min(scoped_cap, 2 * vmem_need))

    # Advisory cost: padded sizes + operand refetch factors.
    x_reads = grid_n if (n_outer or (ktiled and grid_n > 1)) else 1
    w_reads = grid_m if ((grid_n > 1 and not n_outer) or (ktiled and grid_m > 1)) else 1
    cost = pl.CostEstimate(
        flops=2 * B * K * n_pad,
        transcendentals=0,
        bytes_accessed=int(x_reads * B * K * itemsize
                           + w_reads * K * n_pad * itemsize
                           + 4 * (n_pad + B * n_pad)),
    )

    out = pl.pallas_call(
        kernel,
        out_shape=jax.ShapeDtypeStruct((B, n_pad), out_dtype),
        grid_spec=pltpu.PrefetchScalarGridSpec(
            num_scalar_prefetch=0,
            grid=grid,
            in_specs=[
                pl.BlockSpec((tm, tk), x_map),       # rows of x
                pl.BlockSpec((tk, tn), w_map),       # weight slab
                pl.BlockSpec((1, tn), b_map),        # bias slab
            ],
            out_specs=pl.BlockSpec((tm, tn), o_map),
            scratch_shapes=scratch,
        ),
        compiler_params=pltpu.CompilerParams(**compiler_kwargs),
        cost_estimate=cost,
    )(x, w, b2)

    # Only reached when N had to be tiled/padded (rare for value heads).
    # TODO(synk): consumers should keep the N-padded layout to avoid this extra HBM pass.
    return out[:, :N] if n_pad != N else out


def init_params(key, input_size: int, output_size: int):
    """Deterministic init mirroring torch.nn.Linear defaults (uniform +/- 1/sqrt(in))."""
    k_w, k_b = jax.random.split(key)
    bound = 1.0 / math.sqrt(input_size)
    # PyTorch stores weight as [out, in]; we keep the transposed [in, out] layout.
    w = jax.random.uniform(k_w, (input_size, output_size),
                           minval=-bound, maxval=bound, dtype=jnp.float32)
    b = jax.random.uniform(k_b, (output_size,),
                           minval=-bound, maxval=bound, dtype=jnp.float32)
    return w, b


if __name__ == "__main__":
    key = jax.random.PRNGKey(0)
    k_x, k_p = jax.random.split(key)

    batch, input_size, output_size = 2, 32, 16
    x = jax.random.normal(k_x, (batch, input_size), dtype=jnp.float32)
    w, b = init_params(k_p, input_size, output_size)

    out = jax.block_until_ready(value_head_core(x, w, b))

    # Reference check in plain JAX (matches relu(nn.Linear(x))).
    ref = jnp.maximum(x @ w + b, 0.0)
    assert out.shape == (batch, output_size)
    assert jnp.allclose(out, ref, atol=1e-5, rtol=1e-5)

    print("KERNEL_OK")
</pallas_src>

<mosaic_0001>
module attributes {stable_mosaic.version = 11 : i64} {
  func.func @_fused_kernel(%arg0: i32, %arg1: i32, %arg2: i32, %arg3: memref<2x32xf32, #tpu.memory_space<vmem>>, %arg4: memref<32x16xf32, #tpu.memory_space<vmem>>, %arg5: memref<1x16xf32, #tpu.memory_space<vmem>>, %arg6: memref<2x16xf32, #tpu.memory_space<vmem>>) attributes {dimension_semantics = [#tpu.dimension_semantics<parallel>, #tpu.dimension_semantics<parallel>, #tpu.dimension_semantics<arbitrary>], iteration_bounds = array<i64: 1, 1, 1>, scalar_prefetch = 0 : i64, scratch_operands = 0 : i64, tpu.core_type = #tpu.core_type<tc>, window_params = [{transform_indices = @transform_0, window_bounds = array<i64: 2, 32>}, {transform_indices = @transform_1, window_bounds = array<i64: 32, 16>}, {transform_indices = @transform_2, window_bounds = array<i64: 1, 16>}, {transform_indices = @transform_3, window_bounds = array<i64: 2, 16>}]} {
    %c0 = arith.constant 0 : index
    %c0_0 = arith.constant 0 : index
    %0 = vector.load %arg3[%c0, %c0_0] : memref<2x32xf32, #tpu.memory_space<vmem>>, vector<2x32xf32>
    %c0_1 = arith.constant 0 : index
    %c0_2 = arith.constant 0 : index
    %1 = vector.load %arg4[%c0_1, %c0_2] : memref<32x16xf32, #tpu.memory_space<vmem>>, vector<32x16xf32>
    %cst = arith.constant dense<0.000000e+00> : vector<2x16xf32>
    %2 = tpu.matmul %0, %1, %cst {dimension_numbers = #tpu.dot_dimension_numbers<[1], [0], [0], [1], [0, 0, 1, 1], [], []>} : vector<2x32xf32>, vector<32x16xf32>, vector<2x16xf32> -> vector<2x16xf32>
    %c0_3 = arith.constant 0 : index
    %c0_4 = arith.constant 0 : index
    %3 = vector.load %arg5[%c0_3, %c0_4] : memref<1x16xf32, #tpu.memory_space<vmem>>, vector<1x16xf32>
    %4 = vector.broadcast %3 : vector<1x16xf32> to vector<2x16xf32>
    %5 = arith.addf %2, %4 : vector<2x16xf32>
    %cst_5 = arith.constant 0.000000e+00 : f32
    %6 = vector.broadcast %cst_5 : f32 to vector<2x16xf32>
    %7 = arith.maximumf %5, %6 : vector<2x16xf32>
    %c0_6 = arith.constant 0 : index
    %c0_7 = arith.constant 0 : index
    %8 = vector.load %arg6[%c0_6, %c0_7] : memref<2x16xf32, #tpu.memory_space<vmem>>, vector<2x16xf32>
    tpu.vector_store %arg6[%c0_6, %c0_7], %7 {strides = array<i32>} : memref<2x16xf32, #tpu.memory_space<vmem>>, vector<2x16xf32>,
    return
  }
  func.func @transform_0(%arg0: i32, %arg1: i32, %arg2: i32) -> (i32, i32) {
    %c0_i32 = arith.constant 0 : i32
    return %arg0, %arg2 : i32, i32
  }
  func.func @transform_1(%arg0: i32, %arg1: i32, %arg2: i32) -> (i32, i32) {
    %c0_i32 = arith.constant 0 : i32
    return %arg2, %arg1 : i32, i32
  }
  func.func @transform_2(%arg0: i32, %arg1: i32, %arg2: i32) -> (i32, i32) {
    %c0_i32 = arith.constant 0 : i32
    %c0_i32_0 = arith.constant 0 : i32
    return %c0_i32, %arg1 : i32, i32
  }
  func.func @transform_3(%arg0: i32, %arg1: i32, %arg2: i32) -> (i32, i32) {
    %c0_i32 = arith.constant 0 : i32
    return %arg0, %arg1 : i32, i32
  }
}

</mosaic_0001>

<bundles_post_ra>
// kernel: tpu_custom_call.1
= control target key start
LH: loop header
LB: loop body
LE: loop exit
PB: predicated region body
PF: predicated region fallthrough
CT: control target
= control target key end

     0   :  { %v161_v1 = vmov 0.0   ;;  %vm162_vm0 = vmmov 0   ;;  %s205_s0 = inlined_call_operand.vmem [shape: f32[2,32], index: 0, kind: input, shape index: {}]   ;;  %s206_s1 = inlined_call_operand.vmem [shape: f32[32,16], index: 1, kind: input, shape index: {}]   ;;  %s207_s2 = inlined_call_operand.vmem [shape: f32[1,16], index: 2, kind: input, shape index: {}]   ;;  %s208_s3 = inlined_call_operand.hbm [shape: f32[2,16], index: 3, kind: output, shape index: {}]  }
   0x1   :  { %v19_v0 = vld [vmem:[%s206_s1 + $0x18] sm:$0xff]  ;;  %125 = vmatprep.subr.mxu0 %v161_v1  ;;  %v18_v2 = vld [vmem:[%s206_s1 + $0x10] sm:$0xff]  ;;  %133 = vmatprep.mubr.msk.f32.mxu0 %vm162_vm0, %v161_v1 }
   0x2   :  { %126 = vmatpush3.msra.mxu0 %v19_v0 }
   0x3   :  { %8 = vsyncpa [#allocation3], 0  ;;  %127 = vmatprep.subr.mxu0 %v161_v1  ;;  %v17_v3 = vld [vmem:[%s206_s1 + $0x8] sm:$0xff]  ;;  %v16_v4 = vld [vmem:[%s206_s1] sm:$0xff]  ;;  %vm27_vm1 = vcmask 261120   ;;  %s163_s24 = smov [#allocation2]  }
   0x4   :  { %128 = vmatpush3.msra.mxu0 %v18_v2  ;;  %v15_v5 = vld [vmem:[%s205_s0] sm:$0x3]  ;;  %s110_s25 = sshll.u32 %s163_s24, 4  ;;  %vm102_vm2 = vcmask 123904   ;;  %s111_s25 = int_to_ptr.vmem [resolvable:$true] %s110_s25 }
   0x5   :  { %129 = vmatprep.subr.mxu0 %v161_v1  ;;  %v118_v6 = vld [vmem:[%s207_s2] ss:$0 sm:$0xff]  ;;  %s139_s1 = scalar_lea.vmem %s111_s25, 32  ;;  %p144_p1 = scmp.lt.s32.totalorder %s111_s25, %s111_s25 }
   0x6   :  { %130 = vmatpush3.msra.mxu0 %v17_v3  ;;  %p140_p0 = scmp.ne.s32.totalorder %s111_s25, %s139_s1  ;;  %p145_p2 = scmp.lt.s32.totalorder %s139_s1, %s139_s1 }
   0x7   :  { %131 = vmatprep.subr.mxu0 %v161_v1 }
   0x8   :  { %132 = vmatpush3.msra.mxu0 %v16_v4  ;;  %p146_p3 = por %p145_p2, %p144_p1 }
   0x9   :  { %134 = vmatmul.mubr.msk.f32.vlgmr.msra.gmra.mxu0 %vm27_vm1, %v15_v5 }
   0xa   :  { %p147_p4 = pnand %p146_p3, %p140_p0 }
  0xc9   :  { %v97_v7 = vpop.f32.mrf.mxu0 }
  0xca   :  { %v98_v8 = vadd.f32 %v118_v6, %v97_v7 }
  0xcb   :  { %v135_v9 = vpop.f32.mrf.mxu0 }
  0xcc   :  { %v101_v10 = vmax.f32 %v98_v8, 0.0 }
  0xce   :  { %103 = vst.msk [vmem:[#allocation2] sm:$0x3] %vm102_vm2, %v101_v10 }
  0xcf   :  { %150 = shalt.err (!%p147_p4)
}
  0xd0   :  { %113 = dma.vmem_to_hbm [thread:$0]  %s111_s25, 32, %s208_s3, [#allocation3]  }
  0xd1   :  { %159 = dma.done.wait [#allocation3], 32  }
  0xd2   :  { %160 = vsyncadd [#allocation3], 4294967264 }
  0xd3   :  { %117 = vsyncpa [#allocation3], 1 }

</bundles_post_ra>
